<compile_context>
chip_gen: v7x
topology: tpu7x:2x2x1
jax: 0.10.0
libtpu: 0.0.40
codegen_flags: <defaults>
</compile_context>

<pallas_src>
import functools

import jax
import jax.numpy as jnp
from jax.experimental import pallas as pl
from jax.experimental.pallas import tpu as pltpu


def _round_up(x, m):
    return (x + m - 1) // m * m


def _nn3t_kernel(x_ref, w1_ref, b1_ref, w2_ref, b2_ref, w3_ref, b3_ref, o_ref,
                 *, bound, afunc):
    cdt = w1_ref.dtype  # compute dtype (bf16); accumulation stays f32

    # fc1 + activation: (bb, Kp) @ (Kp, Hp) -> f32 (bb, Hp)
    h1 = afunc(
        jnp.dot(x_ref[...], w1_ref[...], preferred_element_type=jnp.float32)
        + b1_ref[...]
    )
    # fc2 + activation: (bb, Hp) @ (Hp, Hp) -> f32 (bb, Hp)
    h2 = afunc(
        jnp.dot(h1.astype(cdt), w2_ref[...], preferred_element_type=jnp.float32)
        + b2_ref[...]
    )
    # fc3: (bb, Hp) @ (Hp, Np) -> f32 (bb, Np)
    y = (jnp.dot(h2.astype(cdt), w3_ref[...], preferred_element_type=jnp.float32)
         + b3_ref[...])

    # bound * tanh(y) (tanh goes to the EUP slot) -> store in final dtype
    o_ref[...] = (bound * jnp.tanh(y)).astype(o_ref.dtype)


def make_nn3t_forward(W1, b1, W2, b2, W3, b3, *, bound, afunc=jax.nn.relu,
                      compute_dtype=jnp.bfloat16, max_batch_block=256):
    """Builds a jitted forward(x) for NN3t.

    Weights are expected as (fan_in, fan_out) (i.e. already transposed vs.
    torch.nn.Linear.weight). Padding/casting of the weights happens ONCE here.
    """
    dim_in, nh = W1.shape
    dim_out = W3.shape[1]
    assert W1.shape == (dim_in, nh)
    assert W2.shape == (nh, nh)
    assert W3.shape == (nh, dim_out)

    # Lane-aligned padded sizes. Zero padding is exact for any afunc:
    #   - padded input columns multiply zero W1 rows,
    #   - padded hidden columns hold afunc(0) but only ever multiply zero rows
    #     of the next (padded) weight matrix,
    #   - padded output columns are sliced off in the wrapper.
    Kp = _round_up(dim_in, 128)
    Hp = _round_up(nh, 128)
    Np = _round_up(dim_out, 128)

    f32 = jnp.float32
    c_item = jnp.dtype(compute_dtype).itemsize

    # ---- one-time weight padding / casting (hoisted out of the call path) ----
    w1p = jnp.zeros((Kp, Hp), compute_dtype).at[:dim_in, :nh].set(
        W1.astype(compute_dtype))
    b1p = jnp.zeros((1, Hp), f32).at[:, :nh].set(b1.reshape(1, nh).astype(f32))
    w2p = jnp.zeros((Hp, Hp), compute_dtype).at[:nh, :nh].set(
        W2.astype(compute_dtype))
    b2p = jnp.zeros((1, Hp), f32).at[:, :nh].set(b2.reshape(1, nh).astype(f32))
    w3p = jnp.zeros((Hp, Np), compute_dtype).at[:nh, :dim_out].set(
        W3.astype(compute_dtype))
    b3p = jnp.zeros((1, Np), f32).at[:, :dim_out].set(
        b3.reshape(1, dim_out).astype(f32))

    weight_bytes = ((Kp * Hp + Hp * Hp + Hp * Np) * c_item
                    + (2 * Hp + Np) * 4)            # bf16 weights + f32 biases

    # ---- per-generation batch-tile sizing from the VMEM budget ----
    try:
        vmem_cap = int(pltpu.get_tpu_info().vmem_capacity_bytes)
    except Exception:
        vmem_cap = 64 << 20                         # conservative fallback (v7x)

    # Per-batch-row VMEM cost: double-buffered x / out tiles + f32 intermediates
    # (h1, h2, y and bf16 recasts; bounded generously).
    per_row = 2 * Kp * c_item + 2 * Np * 4 + (3 * Hp + 2 * Np) * 4
    # Weights are double-buffered by the pipeline even with a constant index_map.
    budget = int(0.6 * vmem_cap) - 2 * weight_bytes - (4 << 20)
    bb_cap = 16
    if budget > 16 * per_row:
        bb_cap = max(16, min(1024, (budget // per_row) // 16 * 16))
    max_bb = max(16, _round_up(int(max_batch_block), 16))  # keep 16-aligned
    bb_limit = min(max_bb, bb_cap)

    kernel = functools.partial(_nn3t_kernel, bound=float(bound), afunc=afunc)

    @jax.jit
    def forward(x):
        B = x.shape[0]
        x2d = x.reshape(B, -1)
        assert x2d.shape[1] == dim_in, "flattened input does not match dim_in"
        odtype = x.dtype                            # emit final dtype in-kernel
        o_item = jnp.dtype(odtype).itemsize

        bb = min(_round_up(B, 16), bb_limit)        # batch tile (multiple of 16)
        Bp = _round_up(_round_up(B, 16), bb)
        n_blocks = Bp // bb

        xp = jnp.zeros((Bp, Kp), compute_dtype).at[:B, :dim_in].set(
            x2d.astype(compute_dtype))

        # Advisory cost estimate so XLA overlaps the pad/slice ops with the kernel.
        cost = pl.CostEstimate(
            flops=2 * Bp * (Kp * Hp + Hp * Hp + Hp * Np),
            transcendentals=Bp * Np,
            bytes_accessed=(Bp * Kp * c_item + weight_bytes
                            + Bp * Np * o_item),
        )

        # Explicit scoped-VMEM limit: double-buffered weights + tiles + headroom.
        needed = (2 * weight_bytes
                  + 2 * bb * Kp * c_item
                  + 2 * bb * Np * o_item
                  + bb * (3 * Hp + 2 * Np) * 4)
        vmem_limit = int(min(vmem_cap, max(32 << 20, 2 * needed + (8 << 20))))

        # Only shard the batch axis across TensorCores when there is actually more
        # than one block; tiny batches are weight-HBM-bound and splitting them
        # would duplicate the weight DMA on both cores (v7x megacore).
        dims = ("parallel",) if n_blocks > 1 else ("arbitrary",)

        out_padded = pl.pallas_call(
            kernel,
            out_shape=jax.ShapeDtypeStruct((Bp, Np), odtype),
            grid_spec=pltpu.PrefetchScalarGridSpec(
                num_scalar_prefetch=0,
                grid=(n_blocks,),
                in_specs=[
                    pl.BlockSpec((bb, Kp), lambda i: (i, 0)),   # x: batch-tiled
                    pl.BlockSpec((Kp, Hp), lambda i: (0, 0)),   # W1 (resident)
                    pl.BlockSpec((1, Hp), lambda i: (0, 0)),    # b1
                    pl.BlockSpec((Hp, Hp), lambda i: (0, 0)),   # W2
                    pl.BlockSpec((1, Hp), lambda i: (0, 0)),    # b2
                    pl.BlockSpec((Hp, Np), lambda i: (0, 0)),   # W3
                    pl.BlockSpec((1, Np), lambda i: (0, 0)),    # b3
                ],
                out_specs=pl.BlockSpec((bb, Np), lambda i: (i, 0)),
            ),
            compiler_params=pltpu.CompilerParams(
                dimension_semantics=dims,
                vmem_limit_bytes=vmem_limit),
            cost_estimate=cost,
        )(xp, w1p, b1p, w2p, b2p, w3p, b3p)

        return out_padded[:B, :dim_out]

    return forward


def nn3t_reference(x, W1, b1, W2, b2, W3, b3, *, bound, afunc=jax.nn.relu,
                   compute_dtype=jnp.bfloat16):
    """Pure-JAX reference mirroring the kernel's bf16-operand / f32-accum numerics."""
    f32 = jnp.float32
    hp = jax.lax.Precision.HIGHEST
    rd = lambda a: a.astype(compute_dtype).astype(f32)
    x2d = rd(x.reshape(x.shape[0], -1))
    h1 = afunc(jnp.dot(x2d, rd(W1), precision=hp) + b1.astype(f32))
    h2 = afunc(jnp.dot(rd(h1), rd(W2), precision=hp) + b2.astype(f32))
    y = jnp.dot(rd(h2), rd(W3), precision=hp) + b3.astype(f32)
    return (bound * jnp.tanh(y)).astype(x.dtype)


if __name__ == "__main__":
    # Small shapes consistent with the module.
    batch = 2
    x_shape = (batch, 4, 4, 2)          # flattened dim_in = 32
    dim_in = 4 * 4 * 2
    dim_out = 16
    module_size = 32                    # args.module_size (>= 3)
    nh = module_size // 2
    bound = 2.0                         # args.bound
    afunc = jax.nn.relu                 # TODO(synk): afunc is user-supplied in PyTorch; ReLU chosen here.

    key = jax.random.PRNGKey(0)
    kx, kw1, kb1, kw2, kb2, kw3, kb3 = jax.random.split(key, 7)

    x = jax.random.normal(kx, x_shape, dtype=jnp.float32)

    # Deterministic init mirroring PyTorch nn.Linear's uniform(-stdv, stdv).
    def init_linear(kw, kb, fan_in, fan_out):
        s = 1.0 / fan_in ** 0.5
        W = jax.random.uniform(kw, (fan_in, fan_out), minval=-s, maxval=s,
                               dtype=jnp.float32)
        b = jax.random.uniform(kb, (fan_out,), minval=-s, maxval=s,
                               dtype=jnp.float32)
        return W, b

    W1, b1 = init_linear(kw1, kb1, dim_in, nh)
    W2, b2 = init_linear(kw2, kb2, nh, nh)
    W3, b3 = init_linear(kw3, kb3, nh, dim_out)

    # Build once (weights padded/cast here, NOT per call), then call.
    forward = make_nn3t_forward(W1, b1, W2, b2, W3, b3, bound=bound, afunc=afunc)
    out = forward(x)
    out = jax.block_until_ready(out)

    ref = nn3t_reference(x, W1, b1, W2, b2, W3, b3, bound=bound, afunc=afunc)
    assert out.shape == (batch, dim_out)
    assert out.dtype == x.dtype
    assert jnp.allclose(out, ref, atol=1e-4, rtol=1e-4), "mismatch vs reference"

    print("KERNEL_OK")
</pallas_src>

<mosaic_0001>
module attributes {stable_mosaic.version = 11 : i64} {
  func.func @_nn3t_kernel(%arg0: i32, %arg1: memref<16x128xbf16, #tpu.memory_space<vmem>>, %arg2: memref<128x128xbf16, #tpu.memory_space<vmem>>, %arg3: memref<1x128xf32, #tpu.memory_space<vmem>>, %arg4: memref<128x128xbf16, #tpu.memory_space<vmem>>, %arg5: memref<1x128xf32, #tpu.memory_space<vmem>>, %arg6: memref<128x128xbf16, #tpu.memory_space<vmem>>, %arg7: memref<1x128xf32, #tpu.memory_space<vmem>>, %arg8: memref<16x128xf32, #tpu.memory_space<vmem>>) attributes {dimension_semantics = [#tpu.dimension_semantics<arbitrary>], iteration_bounds = array<i64: 1>, scalar_prefetch = 0 : i64, scratch_operands = 0 : i64, tpu.core_type = #tpu.core_type<tc>, window_params = [{transform_indices = @transform_0, window_bounds = array<i64: 16, 128>}, {pipeline_mode = #tpu.pipeline_mode<synchronous>, transform_indices = @transform_1, window_bounds = array<i64: 128, 128>}, {pipeline_mode = #tpu.pipeline_mode<synchronous>, transform_indices = @transform_2, window_bounds = array<i64: 1, 128>}, {pipeline_mode = #tpu.pipeline_mode<synchronous>, transform_indices = @transform_3, window_bounds = array<i64: 128, 128>}, {pipeline_mode = #tpu.pipeline_mode<synchronous>, transform_indices = @transform_4, window_bounds = array<i64: 1, 128>}, {pipeline_mode = #tpu.pipeline_mode<synchronous>, transform_indices = @transform_5, window_bounds = array<i64: 128, 128>}, {pipeline_mode = #tpu.pipeline_mode<synchronous>, transform_indices = @transform_6, window_bounds = array<i64: 1, 128>}, {transform_indices = @transform_7, window_bounds = array<i64: 16, 128>}]} {
    %c0 = arith.constant 0 : index
    %c0_0 = arith.constant 0 : index
    %0 = vector.load %arg1[%c0, %c0_0] : memref<16x128xbf16, #tpu.memory_space<vmem>>, vector<16x128xbf16>
    %c0_1 = arith.constant 0 : index
    %c0_2 = arith.constant 0 : index
    %1 = vector.load %arg2[%c0_1, %c0_2] : memref<128x128xbf16, #tpu.memory_space<vmem>>, vector<128x128xbf16>
    %cst = arith.constant dense<0.000000e+00> : vector<16x128xf32>
    %2 = tpu.matmul %0, %1, %cst {dimension_numbers = #tpu.dot_dimension_numbers<[1], [0], [0], [1], [0, 0, 1, 1], [], []>} : vector<16x128xbf16>, vector<128x128xbf16>, vector<16x128xf32> -> vector<16x128xf32>
    %c0_3 = arith.constant 0 : index
    %c0_4 = arith.constant 0 : index
    %3 = vector.load %arg3[%c0_3, %c0_4] : memref<1x128xf32, #tpu.memory_space<vmem>>, vector<1x128xf32>
    %4 = vector.broadcast %3 : vector<1x128xf32> to vector<16x128xf32>
    %5 = arith.addf %2, %4 : vector<16x128xf32>
    %cst_5 = arith.constant 0.000000e+00 : f32
    %6 = vector.broadcast %cst_5 : f32 to vector<16x128xf32>
    %7 = arith.maximumf %5, %6 : vector<16x128xf32>
    %8 = arith.truncf %7 : vector<16x128xf32> to vector<16x128xbf16>
    %c0_6 = arith.constant 0 : index
    %c0_7 = arith.constant 0 : index
    %9 = vector.load %arg4[%c0_6, %c0_7] : memref<128x128xbf16, #tpu.memory_space<vmem>>, vector<128x128xbf16>
    %cst_8 = arith.constant dense<0.000000e+00> : vector<16x128xf32>
    %10 = tpu.matmul %8, %9, %cst_8 {dimension_numbers = #tpu.dot_dimension_numbers<[1], [0], [0], [1], [0, 0, 1, 1], [], []>} : vector<16x128xbf16>, vector<128x128xbf16>, vector<16x128xf32> -> vector<16x128xf32>
    %c0_9 = arith.constant 0 : index
    %c0_10 = arith.constant 0 : index
    %11 = vector.load %arg5[%c0_9, %c0_10] : memref<1x128xf32, #tpu.memory_space<vmem>>, vector<1x128xf32>
    %12 = vector.broadcast %11 : vector<1x128xf32> to vector<16x128xf32>
    %13 = arith.addf %10, %12 : vector<16x128xf32>
    %cst_11 = arith.constant 0.000000e+00 : f32
    %14 = vector.broadcast %cst_11 : f32 to vector<16x128xf32>
    %15 = arith.maximumf %13, %14 : vector<16x128xf32>
    %16 = arith.truncf %15 : vector<16x128xf32> to vector<16x128xbf16>
    %c0_12 = arith.constant 0 : index
    %c0_13 = arith.constant 0 : index
    %17 = vector.load %arg6[%c0_12, %c0_13] : memref<128x128xbf16, #tpu.memory_space<vmem>>, vector<128x128xbf16>
    %cst_14 = arith.constant dense<0.000000e+00> : vector<16x128xf32>
    %18 = tpu.matmul %16, %17, %cst_14 {dimension_numbers = #tpu.dot_dimension_numbers<[1], [0], [0], [1], [0, 0, 1, 1], [], []>} : vector<16x128xbf16>, vector<128x128xbf16>, vector<16x128xf32> -> vector<16x128xf32>
    %c0_15 = arith.constant 0 : index
    %c0_16 = arith.constant 0 : index
    %19 = vector.load %arg7[%c0_15, %c0_16] : memref<1x128xf32, #tpu.memory_space<vmem>>, vector<1x128xf32>
    %20 = vector.broadcast %19 : vector<1x128xf32> to vector<16x128xf32>
    %21 = arith.addf %18, %20 : vector<16x128xf32>
    %22 = math.tanh %21 : vector<16x128xf32>
    %cst_17 = arith.constant 2.000000e+00 : f32
    %23 = vector.broadcast %cst_17 : f32 to vector<16x128xf32>
    %24 = arith.mulf %23, %22 : vector<16x128xf32>
    %c0_18 = arith.constant 0 : index
    %c0_19 = arith.constant 0 : index
    %25 = vector.load %arg8[%c0_18, %c0_19] : memref<16x128xf32, #tpu.memory_space<vmem>>, vector<16x128xf32>
    tpu.vector_store %arg8[%c0_18, %c0_19], %24 {strides = array<i32>} : memref<16x128xf32, #tpu.memory_space<vmem>>, vector<16x128xf32>,
    return
  }
  func.func @transform_0(%arg0: i32) -> (i32, i32) {
    %c0_i32 = arith.constant 0 : i32
    %c0_i32_0 = arith.constant 0 : i32
    return %arg0, %c0_i32 : i32, i32
  }
  func.func @transform_1(%arg0: i32) -> (i32, i32) {
    %c0_i32 = arith.constant 0 : i32
    %c0_i32_0 = arith.constant 0 : i32
    %c0_i32_1 = arith.constant 0 : i32
    return %c0_i32, %c0_i32_0 : i32, i32
  }
  func.func @transform_2(%arg0: i32) -> (i32, i32) {
    %c0_i32 = arith.constant 0 : i32
    %c0_i32_0 = arith.constant 0 : i32
    %c0_i32_1 = arith.constant 0 : i32
    return %c0_i32, %c0_i32_0 : i32, i32
  }
  func.func @transform_3(%arg0: i32) -> (i32, i32) {
    %c0_i32 = arith.constant 0 : i32
    %c0_i32_0 = arith.constant 0 : i32
    %c0_i32_1 = arith.constant 0 : i32
    return %c0_i32, %c0_i32_0 : i32, i32
  }
  func.func @transform_4(%arg0: i32) -> (i32, i32) {
    %c0_i32 = arith.constant 0 : i32
    %c0_i32_0 = arith.constant 0 : i32
    %c0_i32_1 = arith.constant 0 : i32
    return %c0_i32, %c0_i32_0 : i32, i32
  }
  func.func @transform_5(%arg0: i32) -> (i32, i32) {
    %c0_i32 = arith.constant 0 : i32
    %c0_i32_0 = arith.constant 0 : i32
    %c0_i32_1 = arith.constant 0 : i32
    return %c0_i32, %c0_i32_0 : i32, i32
  }
  func.func @transform_6(%arg0: i32) -> (i32, i32) {
    %c0_i32 = arith.constant 0 : i32
    %c0_i32_0 = arith.constant 0 : i32
    %c0_i32_1 = arith.constant 0 : i32
    return %c0_i32, %c0_i32_0 : i32, i32
  }
  func.func @transform_7(%arg0: i32) -> (i32, i32) {
    %c0_i32 = arith.constant 0 : i32
    %c0_i32_0 = arith.constant 0 : i32
    return %arg0, %c0_i32 : i32, i32
  }
}

</mosaic_0001>

<bundles_post_ra>
// kernel: forward.1
= control target key start
LH: loop header
LB: loop body
LE: loop exit
PB: predicated region body
PF: predicated region fallthrough
CT: control target
= control target key end

     0   :  { %12 = vsyncpa [#allocation3], 0  ;;  %s757_s0 = inlined_call_operand.vmem [shape: bf16[16,128], index: 0, kind: input, shape index: {}]   ;;  %s758_s1 = inlined_call_operand.hbm [shape: bf16[128,128], index: 1, kind: input, shape index: {}]   ;;  %s759_s2 = inlined_call_operand.vmem [shape: f32[1,128], index: 2, kind: input, shape index: {}]   ;;  %s760_s3 = inlined_call_operand.hbm [shape: bf16[128,128], index: 3, kind: input, shape index: {}]   ;;  %s761_s4 = inlined_call_operand.vmem [shape: f32[1,128], index: 4, kind: input, shape index: {}]   ;;  %s762_s5 = inlined_call_operand.vmem [shape: bf16[128,128], index: 5, kind: input, shape index: {}]   ;;  %s763_s6 = inlined_call_operand.vmem [shape: f32[1,128], index: 6, kind: input, shape index: {}]   ;;  %s764_s7 = inlined_call_operand.vmem [shape: f32[16,128], index: 7, kind: output, shape index: {}]  }
   0x1   :  { %13 = vsyncpa [#allocation5], 0  ;;  %s615_s24 = smov [#allocation2]   ;;  %s567_s28 = scalar_lea.hbm %s758_s1, 1024 }
   0x2   :  { %s21_s25 = sshll.u32 %s615_s24, 4  ;;  %p568_p0 = scmp.ne.s32.totalorder %s758_s1, %s567_s28  ;;  %s22_s25 = int_to_ptr.vmem [resolvable:$true] %s21_s25 }
   0x3   :  { %p571_p1 = scmp.lt.u32.totalorder %s567_s28, %s758_s1 }
   0x5   :  { %p573_p2 = pnand %p571_p1, %p568_p0 }
   0x7   :  { %576 = shalt.err (!%p573_p2)
}
   0x8   :  { %s577_s10 = scalar_lea.vmem %s22_s25, 1024  ;;  %p582_p4 = scmp.lt.s32.totalorder %s22_s25, %s22_s25 }
   0x9   :  { %p578_p3 = scmp.ne.s32.totalorder %s22_s25, %s577_s10  ;;  %p583_p5 = scmp.lt.s32.totalorder %s577_s10, %s577_s10 }
   0xb   :  { %p584_p6 = por %p583_p5, %p582_p4 }
   0xd   :  { %p585_p7 = pnand %p584_p6, %p578_p3 }
   0xf   :  { %588 = shalt.err (!%p585_p7)
}
  0x10   :  { %s616_s11 = smov 64   ;;  %s617_s12 = smov 4  }
  0x11   :  { %27 = dma.hbm_to_vmem [thread:$0]  %s758_s1, 1024, %s22_s25, [#allocation3], %s616_s11, %s616_s11, %s617_s12  }
  0x12   :  { %s618_s15 = smov [#allocation4]   ;;  %s589_s19 = scalar_lea.hbm %s760_s3, 1024 }
  0x13   :  { %s35_s16 = sshll.u32 %s618_s15, 4  ;;  %p590_p8 = scmp.ne.s32.totalorder %s760_s3, %s589_s19  ;;  %s36_s16 = int_to_ptr.vmem [resolvable:$true] %s35_s16 }
  0x14   :  { %p593_p9 = scmp.lt.u32.totalorder %s589_s19, %s760_s3 }
  0x16   :  { %p595_p10 = pnand %p593_p9, %p590_p8 }
  0x18   :  { %598 = shalt.err (!%p595_p10)
}
  0x19   :  { %s599_s24 = scalar_lea.vmem %s36_s16, 1024  ;;  %p604_p12 = scmp.lt.s32.totalorder %s36_s16, %s36_s16 }
  0x1a   :  { %p600_p11 = scmp.ne.s32.totalorder %s36_s16, %s599_s24  ;;  %p605_p13 = scmp.lt.s32.totalorder %s599_s24, %s599_s24 }
  0x1c   :  { %p606_p0 = por %p605_p13, %p604_p12 }
  0x1e   :  { %p607_p1 = pnand %p606_p0, %p600_p11 }
  0x20   :  { %610 = shalt.err (!%p607_p1)
}
  0x21   :  { %41 = dma.hbm_to_vmem [thread:$0]  %s760_s3, 1024, %s36_s16, [#allocation5], %s616_s11, %s616_s11, %s617_s12  }
  0x22   :  { %611 = dma.done.wait [#allocation3], 1024  }
  0x23   :  { %612 = vsyncadd [#allocation3], 4294966272 }
  0x24   :  { %613 = dma.done.wait [#allocation5], 1024  }
  0x25   :  { %614 = vsyncadd [#allocation5], 4294966272  ;;  %v619_v0 = vmov 0.0   ;;  %vm620_vm0 = vmmov 0   ;;  %v538_v1 = vld [vmem:[#allocation2] sm:$0xff]   ;;  %v539_v2 = vld [vmem:[#allocation2 + $0x8] sm:$0xff]  }
  0x26   :  { %472 = vmatprep.subr.bf16.mxu0 %v619_v0  ;;  %488 = vmatprep.mubr.msk.bf16.mxu0 %vm620_vm0, %v619_v0  ;;  %v540_v3 = vld [vmem:[#allocation2 + $0x10] sm:$0xff]   ;;  %v547_v4 = vld [vmem:[#allocation4] sm:$0xff]   ;;  %v541_v5 = vld [vmem:[#allocation2 + $0x18] sm:$0xff]  }
  0x27   :  { %492 = vmatprep.subr.bf16.mxu1 %v619_v0  ;;  %508 = vmatprep.mubr.msk.bf16.mxu1 %vm620_vm0, %v619_v0  ;;  %v548_v6 = vld [vmem:[#allocation4 + $0x8] sm:$0xff]   ;;  %v542_v7 = vld [vmem:[#allocation2 + $0x20] sm:$0xff]   ;;  %v549_v8 = vld [vmem:[#allocation4 + $0x10] sm:$0xff]  }
  0x28   :  { %473 = vmatpush3.bf16.msra.mxu0 %v538_v1  ;;  %493 = vmatpush3.bf16.msra.mxu1 %v547_v4  ;;  %v543_v9 = vld [vmem:[#allocation2 + $0x28] sm:$0xff]   ;;  %v550_v10 = vld [vmem:[#allocation4 + $0x18] sm:$0xff]   ;;  %v544_v11 = vld [vmem:[#allocation2 + $0x30] sm:$0xff]  }
  0x29   :  { %474 = vmatprep.subr.bf16.mxu0 %v619_v0  ;;  %494 = vmatprep.subr.bf16.mxu1 %v619_v0  ;;  %v551_v12 = vld [vmem:[#allocation4 + $0x20] sm:$0xff]   ;;  %v545_v13 = vld [vmem:[#allocation2 + $0x38] sm:$0xff]   ;;  %v552_v14 = vld [vmem:[#allocation4 + $0x28] sm:$0xff]  }
  0x2a   :  { %v546_v15 = vld [vmem:[%s757_s0] sm:$0xff]   ;;  %v553_v16 = vld [vmem:[#allocation4 + $0x30] sm:$0xff]   ;;  %v554_v17 = vld [vmem:[#allocation4 + $0x38] sm:$0xff]  }
  0x2b   :  { %v555_v18 = vld [vmem:[%s762_s5] sm:$0xff]   ;;  %v556_v19 = vld [vmem:[%s762_s5 + $0x8] sm:$0xff]   ;;  %v557_v20 = vld [vmem:[%s762_s5 + $0x10] sm:$0xff]  }
  0x2c   :  { %475 = vmatpush3.bf16.msra.mxu0 %v539_v2  ;;  %495 = vmatpush3.bf16.msra.mxu1 %v548_v6  ;;  %v558_v21 = vld [vmem:[%s762_s5 + $0x18] sm:$0xff]   ;;  %v559_v22 = vld [vmem:[%s762_s5 + $0x20] sm:$0xff]   ;;  %v560_v23 = vld [vmem:[%s762_s5 + $0x28] sm:$0xff]  }
  0x2d   :  { %476 = vmatprep.subr.bf16.mxu0 %v619_v0  ;;  %496 = vmatprep.subr.bf16.mxu1 %v619_v0  ;;  %v417_v24 = vld [vmem:[%s759_s2] ss:$0 sm:$0xff]  ;;  %v561_v34 = vld [vmem:[%s762_s5 + $0x30] sm:$0xff]   ;;  %v562_v35 = vld [vmem:[%s762_s5 + $0x38] sm:$0xff]  }
  0x2e   :  { %v427_v36 = vld [vmem:[%s761_s4] ss:$0 sm:$0xff] }
  0x2f   :  { %v436_v46 = vld [vmem:[%s763_s6] ss:$0 sm:$0xff] }
  0x30   :  { %477 = vmatpush3.bf16.msra.mxu0 %v540_v3  ;;  %497 = vmatpush3.bf16.msra.mxu1 %v549_v8 }
  0x31   :  { %478 = vmatprep.subr.bf16.mxu0 %v619_v0  ;;  %498 = vmatprep.subr.bf16.mxu1 %v619_v0 }
  0x34   :  { %479 = vmatpush3.bf16.msra.mxu0 %v541_v5  ;;  %499 = vmatpush3.bf16.msra.mxu1 %v550_v10 }
  0x35   :  { %480 = vmatprep.subr.bf16.mxu0 %v619_v0  ;;  %500 = vmatprep.subr.bf16.mxu1 %v619_v0 }
  0x38   :  { %481 = vmatpush3.bf16.msra.mxu0 %v542_v7  ;;  %501 = vmatpush3.bf16.msra.mxu1 %v551_v12 }
  0x39   :  { %482 = vmatprep.subr.bf16.mxu0 %v619_v0  ;;  %502 = vmatprep.subr.bf16.mxu1 %v619_v0 }
  0x3c   :  { %483 = vmatpush3.bf16.msra.mxu0 %v543_v9  ;;  %503 = vmatpush3.bf16.msra.mxu1 %v552_v14 }
  0x3d   :  { %484 = vmatprep.subr.bf16.mxu0 %v619_v0  ;;  %504 = vmatprep.subr.bf16.mxu1 %v619_v0 }
  0x40   :  { %485 = vmatpush3.bf16.msra.mxu0 %v544_v11  ;;  %505 = vmatpush3.bf16.msra.mxu1 %v553_v16 }
  0x41   :  { %486 = vmatprep.subr.bf16.mxu0 %v619_v0  ;;  %506 = vmatprep.subr.bf16.mxu1 %v619_v0 }
  0x44   :  { %487 = vmatpush3.bf16.msra.mxu0 %v545_v13  ;;  %507 = vmatpush3.bf16.msra.mxu1 %v554_v17 }
  0x45   :  { %512 = vmatprep.subr.bf16.mxu0 %v619_v0 }
  0x47   :  { %489 = vmatmul.mubr.bf16.vlgmr.msra.gmra.mrb[0].mxu0 %v546_v15 }
  0x48   :  { %528 = vmatprep.mubr.msk.bf16.mxu0 %vm620_vm0, %v619_v0  ;;  %513 = vmatpush3.bf16.msra.mxu0 %v555_v18 }
  0x49   :  { %514 = vmatprep.subr.bf16.mxu0 %v619_v0 }
  0x4c   :  { %515 = vmatpush3.bf16.msra.mxu0 %v556_v19 }
  0x4d   :  { %516 = vmatprep.subr.bf16.mxu0 %v619_v0 }
  0x50   :  { %517 = vmatpush3.bf16.msra.mxu0 %v557_v20 }
  0x51   :  { %518 = vmatprep.subr.bf16.mxu0 %v619_v0 }
  0x54   :  { %519 = vmatpush3.bf16.msra.mxu0 %v558_v21 }
  0x55   :  { %520 = vmatprep.subr.bf16.mxu0 %v619_v0 }
  0x58   :  { %521 = vmatpush3.bf16.msra.mxu0 %v559_v22 }
  0x59   :  { %522 = vmatprep.subr.bf16.mxu0 %v619_v0 }
  0x5c   :  { %523 = vmatpush3.bf16.msra.mxu0 %v560_v23 }
  0x5d   :  { %524 = vmatprep.subr.bf16.mxu0 %v619_v0 }
  0x60   :  { %525 = vmatpush3.bf16.msra.mxu0 %v561_v34 }
  0x61   :  { %526 = vmatprep.subr.bf16.mxu0 %v619_v0 }
  0x64   :  { %527 = vmatpush3.bf16.msra.mxu0 %v562_v35 }
 0x11a   :  { %v168_v25 = vpop.f32.mrb[0].mxu0 }
 0x11b   :  { %v169_v26 = vadd.f32 %v417_v24, %v168_v25  ;;  %v490_v27 = vpop.f32.mrb[1].mxu0 }
 0x11c   :  { %v171_v28 = vpop.f32.mrb[2].mxu0 }
 0x11d   :  { %v172_v29 = vadd.f32 %v417_v24, %v171_v28  ;;  %v491_v30 = vpop.f32.mrb[3].mxu0  ;;  %v175_v31 = vmax.f32 %v169_v26, 0.0 }
 0x11f   :  { %v176_v32 = vmax.f32 %v172_v29, 0.0 }
 0x121   :  { %v177_v33 = vpack.c.bf16 %v176_v32, %v175_v31 }
 0x123   :  { %509 = vmatmul.mubr.bf16.vlgmr.msra.gmra.mrb[0].mxu1 %v177_v33 }
 0x1f6   :  { %v283_v37 = vpop.f32.mrb[0].mxu1 }
 0x1f7   :  { %v284_v38 = vadd.f32 %v427_v36, %v283_v37  ;;  %v510_v39 = vpop.f32.mrb[1].mxu1 }
 0x1f8   :  { %v286_v40 = vpop.f32.mrb[2].mxu1 }
 0x1f9   :  { %v287_v41 = vadd.f32 %v427_v36, %v286_v40  ;;  %v511_v42 = vpop.f32.mrb[3].mxu1  ;;  %v290_v43 = vmax.f32 %v284_v38, 0.0 }
 0x1fb   :  { %v291_v44 = vmax.f32 %v287_v41, 0.0 }
 0x1fd   :  { %v292_v45 = vpack.c.bf16 %v291_v44, %v290_v43 }
 0x1ff   :  { %529 = vmatmul.mubr.bf16.vlgmr.msra.gmra.mrb[4].mxu0 %v292_v45 }
 0x2d2   :  { %v398_v47 = vpop.f32.mrb[4].mxu0 }
 0x2d3   :  { %v399_v48 = vadd.f32 %v436_v46, %v398_v47  ;;  %v530_v49 = vpop.f32.mrb[5].mxu0 }
 0x2d4   :  { %v401_v50 = vpop.f32.mrb[6].mxu0 }
 0x2d5   :  { %563 = vtanh.f32 %v399_v48  ;;  %v402_v51 = vadd.f32 %v436_v46, %v401_v50  ;;  %v531_v52 = vpop.f32.mrb[7].mxu0 }
 0x2d7   :  { %565 = vtanh.f32 %v402_v51 }
 0x2df   :  { %v564_v53 = vpop.eup %563 }
 0x2e0   :  { %v407_v54 = vmul.f32 2.0, %v564_v53 }
 0x2e1   :  { %v566_v55 = vpop.eup %565 }
 0x2e2   :  { %409 = vst [vmem:[%s764_s7] sm:$0xff] %v407_v54  ;;  %v408_v56 = vmul.f32 2.0, %v566_v55 }
 0x2e4   :  { %410 = vst [vmem:[%s764_s7 + $0x8] sm:$0xff] %v408_v56 }
 0x2e5   :  { %415 = vsyncpa [#allocation3], 1 }
 0x2e6   :  { %416 = vsyncpa [#allocation5], 1 }

</bundles_post_ra>
